<compile_context>
chip_gen: v7x
topology: tpu7x:2x2x1
jax: 0.10.0
libtpu: 0.0.40
codegen_flags: <defaults>
</compile_context>

<pallas_src>
import jax
import jax.numpy as jnp
from jax.experimental import pallas as pl
from jax.experimental.pallas import tpu as pltpu


def _round_up(v: int, m: int) -> int:
    return ((v + m - 1) // m) * m


def _pick_tile_b(batch: int) -> int:
    """Large tiles amortize ~0.35us/grid-step overhead; keep >=2 steps when the
    batch allows it (v7x has 2 TensorCores) and never exceed the 8-padded batch."""
    tile = 2048
    tile = min(tile, _round_up(pl.cdiv(batch, 2), 256))
    tile = min(tile, _round_up(batch, 8))
    return max(tile, 8)


def _use_bf16_elementwise() -> bool:
    """bf16 bias+ReLU only where the VPU has native bf16 (v6e / v7x)."""
    try:
        kind = jax.devices()[0].device_kind.lower()
    except Exception:
        return False
    return not any(tag in kind for tag in ("v2", "v3", "v4", "v5"))


def mlp_kernel(x_ref, w1_ref, b1_ref, w2_ref, b2_ref, w3_ref, b3_ref, o_ref):
    # x_ref: (tile_b, D) f32.  Transpose to feature-major (XLU) and cast to
    # bf16 (VPU) in-kernel; both units have slack under the MXU / step overhead.
    xt = x_ref[...].T.astype(jnp.bfloat16)                       # (D, tile_b)

    # fc1 + ReLU: (256, D) @ (D, tile_b) -> (256, tile_b), f32 MXU accumulation.
    h1 = jnp.dot(w1_ref[...], xt, preferred_element_type=jnp.float32)
    h1 = jnp.maximum(h1.astype(b1_ref.dtype) + b1_ref[...], 0)   # bf16 on v6e/v7x, f32 on v5e
    h1 = h1.astype(jnp.bfloat16)                                 # no-op on the bf16 path

    # fc2 + ReLU: (128, 256) @ (256, tile_b) -> (128, tile_b).
    h2 = jnp.dot(w2_ref[...], h1, preferred_element_type=jnp.float32)
    h2 = jnp.maximum(h2.astype(b2_ref.dtype) + b2_ref[...], 0)

    # fc3 (out width 1) + Sigmoid: VPU multiply + XLU sublane reduction in f32.
    logits = jnp.sum(h2.astype(jnp.float32) * w3_ref[...], axis=0, keepdims=True)
    o_ref[...] = jax.nn.sigmoid(logits + b3_ref[...]).astype(o_ref.dtype)  # (1, tile_b), lane-dense


def simple_nn_forward(x, params, *, tile_b=None):
    """x: (B, D) float32.  params in PyTorch nn.Linear layout:
       w1 (256, D), b1 (256, 1), w2 (128, 256), b2 (128, 1), w3 (128, 1) [=W3^T], b3 (1, 1)."""
    B, D = x.shape
    w1, b1 = params["w1"], params["b1"]
    w2, b2 = params["w2"], params["b2"]
    w3, b3 = params["w3"], params["b3"]

    if tile_b is None:
        tile_b = _pick_tile_b(B)
    n_tiles = pl.cdiv(B, tile_b)
    b_pad = n_tiles * tile_b

    # bf16 weights halve HBM->VMEM bytes and use the MXU's native bf16 path.
    w1b = w1.astype(jnp.bfloat16)
    w2b = w2.astype(jnp.bfloat16)
    ew = jnp.bfloat16 if _use_bf16_elementwise() else jnp.float32
    b1e = b1.astype(ew)
    b2e = b2.astype(ew)

    # Constant index_map -> block revisited every step -> DMA'd once, VMEM-resident.
    resident = lambda arr: pl.BlockSpec(arr.shape, lambda i: (0, 0))

    out = pl.pallas_call(
        mlp_kernel,
        out_shape=jax.ShapeDtypeStruct((1, b_pad), jnp.float32),
        grid=(n_tiles,),
        in_specs=[
            # x streamed per batch tile; last (ragged) block is masked by Pallas
            # and its garbage columns never reach the [:B] slice below.
            # (If the x DMA ever shows up exposed at tile_b=2048+, add
            #  pipeline_mode=pl.Buffered(3) here.)
            pl.BlockSpec((tile_b, D), lambda i: (i, 0)),
            resident(w1b), resident(b1e),
            resident(w2b), resident(b2e),
            resident(w3), resident(b3),
        ],
        # Single output row, (1, tile_b) chunks -> unmasked, 128-aligned stores.
        out_specs=pl.BlockSpec((1, tile_b), lambda i: (0, i)),
        compiler_params=pltpu.CompilerParams(
            dimension_semantics=("parallel",),   # shards grid steps across v7x's 2 TCs
            vmem_limit_bytes=32 << 20,           # ~5 MiB actually used at tile_b=2048
        ),
    )(x, w1b, b1e, w2b, b2e, w3, b3)

    # Layout plumbing only: (1, b_pad) lane-dense slab -> (B, 1).
    return out.reshape(b_pad, 1)[:B]


def init_params(input_size, key):
    """Deterministic init mimicking nn.Linear's U(-1/sqrt(fan_in), 1/sqrt(fan_in)),
    stored in PyTorch (out_features, in_features) layout."""
    ks = jax.random.split(key, 6)

    def linear(kw, kb, fan_in, fan_out):
        bound = 1.0 / jnp.sqrt(jnp.float32(fan_in))
        w = jax.random.uniform(kw, (fan_out, fan_in), jnp.float32, -bound, bound)
        b = jax.random.uniform(kb, (fan_out, 1), jnp.float32, -bound, bound)
        return w, b

    w1, b1 = linear(ks[0], ks[1], input_size, 256)
    w2, b2 = linear(ks[2], ks[3], 256, 128)
    w3, b3 = linear(ks[4], ks[5], 128, 1)
    # w3 stored as (128, 1) = W3^T so the kernel's sublane reduction is direct.
    return {"w1": w1, "b1": b1, "w2": w2, "b2": b2, "w3": jnp.transpose(w3), "b3": b3}


def _reference(x, params):
    h1 = jnp.maximum(x @ params["w1"].T + params["b1"].T, 0.0)
    h2 = jnp.maximum(h1 @ params["w2"].T + params["b2"].T, 0.0)
    return jax.nn.sigmoid(h2 @ params["w3"] + params["b3"].T)


if __name__ == "__main__":
    key = jax.random.PRNGKey(0)
    k_x, k_x2, k_p = jax.random.split(key, 3)

    input_size = 32  # encoded-feature dimension feeding SimpleNN
    params = init_params(input_size, k_p)

    # Small primary test (single tile).
    batch = 8
    x = jax.random.normal(k_x, (batch, input_size), dtype=jnp.float32)
    out = jax.block_until_ready(simple_nn_forward(x, params))
    ref = _reference(x, params)
    assert out.shape == (batch, 1)
    # Tolerance loosened because matmul inputs are bf16 (f32 accumulation).
    assert jnp.allclose(out, ref, atol=2e-2, rtol=2e-2)

    # Multi-tile test: exercises >1 grid step and a ragged last batch block.
    batch2 = 600
    x2 = jax.random.normal(k_x2, (batch2, input_size), dtype=jnp.float32)
    out2 = jax.block_until_ready(simple_nn_forward(x2, params))
    ref2 = _reference(x2, params)
    assert out2.shape == (batch2, 1)
    assert jnp.allclose(out2, ref2, atol=2e-2, rtol=2e-2)

    print("KERNEL_OK")
</pallas_src>

<mosaic_0001>
module attributes {stable_mosaic.version = 11 : i64} {
  func.func @mlp_kernel(%arg0: i32, %arg1: memref<8x32xf32, #tpu.memory_space<vmem>>, %arg2: memref<256x32xbf16, #tpu.memory_space<vmem>>, %arg3: memref<256x1xbf16, #tpu.memory_space<vmem>>, %arg4: memref<128x256xbf16, #tpu.memory_space<vmem>>, %arg5: memref<128x1xbf16, #tpu.memory_space<vmem>>, %arg6: memref<128x1xf32, #tpu.memory_space<vmem>>, %arg7: memref<1x1xf32, #tpu.memory_space<vmem>>, %arg8: memref<1x8xf32, #tpu.memory_space<vmem>>) attributes {dimension_semantics = [#tpu.dimension_semantics<parallel>], iteration_bounds = array<i64: 1>, scalar_prefetch = 0 : i64, scratch_operands = 0 : i64, tpu.core_type = #tpu.core_type<tc>, window_params = [{transform_indices = @transform_0, window_bounds = array<i64: 8, 32>}, {pipeline_mode = #tpu.pipeline_mode<synchronous>, transform_indices = @transform_1, window_bounds = array<i64: 256, 32>}, {pipeline_mode = #tpu.pipeline_mode<synchronous>, transform_indices = @transform_2, window_bounds = array<i64: 256, 1>}, {pipeline_mode = #tpu.pipeline_mode<synchronous>, transform_indices = @transform_3, window_bounds = array<i64: 128, 256>}, {pipeline_mode = #tpu.pipeline_mode<synchronous>, transform_indices = @transform_4, window_bounds = array<i64: 128, 1>}, {pipeline_mode = #tpu.pipeline_mode<synchronous>, transform_indices = @transform_5, window_bounds = array<i64: 128, 1>}, {pipeline_mode = #tpu.pipeline_mode<synchronous>, transform_indices = @transform_6, window_bounds = array<i64: 1, 1>}, {transform_indices = @transform_7, window_bounds = array<i64: 1, 8>}]} {
    %c0 = arith.constant 0 : index
    %c0_0 = arith.constant 0 : index
    %0 = vector.load %arg1[%c0, %c0_0] : memref<8x32xf32, #tpu.memory_space<vmem>>, vector<8x32xf32>
    %1 = tpu.transpose %0, [1, 0] : vector<8x32xf32> -> vector<32x8xf32>
    %2 = arith.truncf %1 : vector<32x8xf32> to vector<32x8xbf16>
    %c0_1 = arith.constant 0 : index
    %c0_2 = arith.constant 0 : index
    %3 = vector.load %arg2[%c0_1, %c0_2] : memref<256x32xbf16, #tpu.memory_space<vmem>>, vector<256x32xbf16>
    %cst = arith.constant dense<0.000000e+00> : vector<256x8xf32>
    %4 = tpu.matmul %3, %2, %cst {dimension_numbers = #tpu.dot_dimension_numbers<[1], [0], [0], [1], [0, 0, 1, 1], [], []>} : vector<256x32xbf16>, vector<32x8xbf16>, vector<256x8xf32> -> vector<256x8xf32>
    %5 = arith.truncf %4 : vector<256x8xf32> to vector<256x8xbf16>
    %c0_3 = arith.constant 0 : index
    %c0_4 = arith.constant 0 : index
    %6 = vector.load %arg3[%c0_3, %c0_4] : memref<256x1xbf16, #tpu.memory_space<vmem>>, vector<256x1xbf16>
    %7 = vector.broadcast %6 : vector<256x1xbf16> to vector<256x8xbf16>
    %8 = arith.addf %5, %7 : vector<256x8xbf16>
    %cst_5 = arith.constant 0.000000e+00 : bf16
    %9 = vector.broadcast %cst_5 : bf16 to vector<256x8xbf16>
    %10 = arith.maximumf %8, %9 : vector<256x8xbf16>
    %c0_6 = arith.constant 0 : index
    %c0_7 = arith.constant 0 : index
    %11 = vector.load %arg4[%c0_6, %c0_7] : memref<128x256xbf16, #tpu.memory_space<vmem>>, vector<128x256xbf16>
    %cst_8 = arith.constant dense<0.000000e+00> : vector<128x8xf32>
    %12 = tpu.matmul %11, %10, %cst_8 {dimension_numbers = #tpu.dot_dimension_numbers<[1], [0], [0], [1], [0, 0, 1, 1], [], []>} : vector<128x256xbf16>, vector<256x8xbf16>, vector<128x8xf32> -> vector<128x8xf32>
    %13 = arith.truncf %12 : vector<128x8xf32> to vector<128x8xbf16>
    %c0_9 = arith.constant 0 : index
    %c0_10 = arith.constant 0 : index
    %14 = vector.load %arg5[%c0_9, %c0_10] : memref<128x1xbf16, #tpu.memory_space<vmem>>, vector<128x1xbf16>
    %15 = vector.broadcast %14 : vector<128x1xbf16> to vector<128x8xbf16>
    %16 = arith.addf %13, %15 : vector<128x8xbf16>
    %cst_11 = arith.constant 0.000000e+00 : bf16
    %17 = vector.broadcast %cst_11 : bf16 to vector<128x8xbf16>
    %18 = arith.maximumf %16, %17 : vector<128x8xbf16>
    %19 = arith.extf %18 : vector<128x8xbf16> to vector<128x8xf32>
    %c0_12 = arith.constant 0 : index
    %c0_13 = arith.constant 0 : index
    %20 = vector.load %arg6[%c0_12, %c0_13] : memref<128x1xf32, #tpu.memory_space<vmem>>, vector<128x1xf32>
    %21 = vector.broadcast %20 : vector<128x1xf32> to vector<128x8xf32>
    %22 = arith.mulf %19, %21 : vector<128x8xf32>
    %cst_14 = arith.constant dense<0.000000e+00> : vector<8xf32>
    %23 = vector.multi_reduction <add>, %22, %cst_14 [0] : vector<128x8xf32> to vector<8xf32>
    %24 = vector.shape_cast %23 : vector<8xf32> to vector<1x8xf32>
    %c0_15 = arith.constant 0 : index
    %c0_16 = arith.constant 0 : index
    %25 = vector.load %arg7[%c0_15, %c0_16] : memref<1x1xf32, #tpu.memory_space<vmem>>, vector<1x1xf32>
    %26 = vector.broadcast %25 : vector<1x1xf32> to vector<1x8xf32>
    %27 = arith.addf %24, %26 : vector<1x8xf32>
    %28 = arith.negf %27 : vector<1x8xf32>
    %29 = math.exp %28 : vector<1x8xf32>
    %cst_17 = arith.constant 1.000000e+00 : f32
    %30 = vector.broadcast %cst_17 : f32 to vector<1x8xf32>
    %31 = arith.addf %30, %29 : vector<1x8xf32>
    %32 = arith.divf %30, %31 : vector<1x8xf32>
    %c0_18 = arith.constant 0 : index
    %c0_19 = arith.constant 0 : index
    %33 = vector.load %arg8[%c0_18, %c0_19] : memref<1x8xf32, #tpu.memory_space<vmem>>, vector<1x8xf32>
    tpu.vector_store %arg8[%c0_18, %c0_19], %32 {strides = array<i32>} : memref<1x8xf32, #tpu.memory_space<vmem>>, vector<1x8xf32>,
    return
  }
  func.func @transform_0(%arg0: i32) -> (i32, i32) {
    %c0_i32 = arith.constant 0 : i32
    %c0_i32_0 = arith.constant 0 : i32
    return %arg0, %c0_i32 : i32, i32
  }
  func.func @transform_1(%arg0: i32) -> (i32, i32) {
    %c0_i32 = arith.constant 0 : i32
    %c0_i32_0 = arith.constant 0 : i32
    %c0_i32_1 = arith.constant 0 : i32
    return %c0_i32, %c0_i32_0 : i32, i32
  }
  func.func @transform_2(%arg0: i32) -> (i32, i32) {
    %c0_i32 = arith.constant 0 : i32
    %c0_i32_0 = arith.constant 0 : i32
    %c0_i32_1 = arith.constant 0 : i32
    return %c0_i32, %c0_i32_0 : i32, i32
  }
  func.func @transform_3(%arg0: i32) -> (i32, i32) {
    %c0_i32 = arith.constant 0 : i32
    %c0_i32_0 = arith.constant 0 : i32
    %c0_i32_1 = arith.constant 0 : i32
    return %c0_i32, %c0_i32_0 : i32, i32
  }
  func.func @transform_4(%arg0: i32) -> (i32, i32) {
    %c0_i32 = arith.constant 0 : i32
    %c0_i32_0 = arith.constant 0 : i32
    %c0_i32_1 = arith.constant 0 : i32
    return %c0_i32, %c0_i32_0 : i32, i32
  }
  func.func @transform_5(%arg0: i32) -> (i32, i32) {
    %c0_i32 = arith.constant 0 : i32
    %c0_i32_0 = arith.constant 0 : i32
    %c0_i32_1 = arith.constant 0 : i32
    return %c0_i32, %c0_i32_0 : i32, i32
  }
  func.func @transform_6(%arg0: i32) -> (i32, i32) {
    %c0_i32 = arith.constant 0 : i32
    %c0_i32_0 = arith.constant 0 : i32
    %c0_i32_1 = arith.constant 0 : i32
    return %c0_i32, %c0_i32_0 : i32, i32
  }
  func.func @transform_7(%arg0: i32) -> (i32, i32) {
    %c0_i32 = arith.constant 0 : i32
    %c0_i32_0 = arith.constant 0 : i32
    return %c0_i32, %arg0 : i32, i32
  }
}

</mosaic_0001>

<bundles_post_ra>
// kernel: tpu_custom_call.1
= control target key start
LH: loop header
LB: loop body
LE: loop exit
PB: predicated region body
PF: predicated region fallthrough
CT: control target
= control target key end

     0   :  { %s2523_s0 = inlined_call_operand.vmem [shape: f32[8,32], index: 0, kind: input, shape index: {}]   ;;  %s2524_s1 = inlined_call_operand.vmem [shape: bf16[256,32], index: 1, kind: input, shape index: {}]   ;;  %s2525_s2 = inlined_call_operand.vmem [shape: bf16[256,1], index: 2, kind: input, shape index: {}]   ;;  %s2526_s3 = inlined_call_operand.vmem [shape: bf16[128,256], index: 3, kind: input, shape index: {}]   ;;  %s2527_s4 = inlined_call_operand.vmem [shape: bf16[128,1], index: 4, kind: input, shape index: {}]   ;;  %s2528_s5 = inlined_call_operand.vmem [shape: f32[128,1], index: 5, kind: input, shape index: {}]   ;;  %s2529_s6 = inlined_call_operand.<no memory space> [shape: f32[1,1], index: 6, kind: input, shape index: {}]   ;;  %s2530_s7 = inlined_call_operand.hbm [shape: f32[1,8], index: 7, kind: output, shape index: {}]  }
   0x1   :  { %v12_v0 = vstv %s2529_s6 }
   0x2   :  { %13 = vst [vmem:[#allocation2] sm:$0x1] %v12_v0 }
   0x3   :  { %v30_v1 = vld [vmem:[%s2523_s0] sm:$0xff]  ;;  %v1900_v3 = vmov 0   ;;  %v421_v6 = vld [vmem:[%s2525_s2 + $0x48] sm:$0xf]  ;;  %v422_v7 = vld [vmem:[%s2525_s2 + $0x4c] sm:$0xf] }
   0x4   :  { %v420_v2 = vld [vmem:[%s2525_s2 + $0x44] sm:$0xf]  ;;  %31 = vxpose.xlu0.b32.start.end [1/1] (short) (narrow) %v30_v1, 32  ;;  %1831 = vset.pattern.permute.xlu1 %v1900_v3  ;;  %v403_v4 = vld [vmem:[%s2525_s2] sm:$0xf]  ;;  %vm177_vm0 = vcmask 261120  }
   0x5   :  { %641 = vperm.xlu1 %1831, %v420_v2   ;;  %v404_v5 = vld [vmem:[%s2525_s2 + $0x4] sm:$0xf]  ;;  %v405_v9 = vld [vmem:[%s2525_s2 + $0x8] sm:$0xf]  ;;  %v406_v10 = vld [vmem:[%s2525_s2 + $0xc] sm:$0xf] }
   0x6   :  { %v1832_v8 = vld [vmem:[%s2524_s1] sm:$0xff]   ;;  %v423_v11 = vld [vmem:[%s2525_s2 + $0x50] sm:$0xf]  ;;  %v424_v12 = vld [vmem:[%s2525_s2 + $0x54] sm:$0xf] }
   0x7   :  { %1778 = vmatprep.mubr.msk.bf16.mxu0 %vm177_vm0, %v1832_v8 }
   0x9   :  { %437 = vperm.xlu1 %1831, %v403_v4  }
   0xd   :  { %449 = vperm.xlu1 %1831, %v404_v5  }
  0x11   :  { %653 = vperm.xlu1 %1831, %v421_v6  }
  0x15   :  { %665 = vperm.xlu1 %1831, %v422_v7  }
  0x19   :  { %461 = vperm.xlu1 %1831, %v405_v9  }
  0x1d   :  { %473 = vperm.xlu1 %1831, %v406_v10  }
  0x21   :  { %677 = vperm.xlu1 %1831, %v423_v11  }
  0x22   :  { %14 = vsyncpa [#allocation4], 0  ;;  %v407_v13 = vld [vmem:[%s2525_s2 + $0x10] sm:$0xf]  ;;  %v408_v14 = vld [vmem:[%s2525_s2 + $0x14] sm:$0xf] }
  0x23   :  { %v425_v15 = vld [vmem:[%s2525_s2 + $0x58] sm:$0xf]  ;;  %v426_v16 = vld [vmem:[%s2525_s2 + $0x5c] sm:$0xf]  ;;  %v419_v18 = vld [vmem:[%s2525_s2 + $0x40] sm:$0xf] }
  0x24   :  { %v409_v17 = vld [vmem:[%s2525_s2 + $0x18] sm:$0xf]  ;;  %v410_v19 = vld [vmem:[%s2525_s2 + $0x1c] sm:$0xf]  ;;  %v427_v20 = vld [vmem:[%s2525_s2 + $0x60] sm:$0xf] }
  0x25   :  { %689 = vperm.xlu1 %1831, %v424_v12   ;;  %v428_v21 = vld [vmem:[%s2525_s2 + $0x64] sm:$0xf]  ;;  %v411_v22 = vld [vmem:[%s2525_s2 + $0x20] sm:$0xf]  ;;  %v429_v24 = vld [vmem:[%s2525_s2 + $0x68] sm:$0xf] }
  0x26   :  { %v412_v23 = vld [vmem:[%s2525_s2 + $0x24] sm:$0xf]  ;;  %v430_v25 = vld [vmem:[%s2525_s2 + $0x6c] sm:$0xf]  ;;  %v413_v26 = vld [vmem:[%s2525_s2 + $0x28] sm:$0xf] }
  0x27   :  { %v414_v27 = vld [vmem:[%s2525_s2 + $0x2c] sm:$0xf]  ;;  %v431_v28 = vld [vmem:[%s2525_s2 + $0x70] sm:$0xf]  ;;  %v432_v29 = vld [vmem:[%s2525_s2 + $0x74] sm:$0xf] }
  0x28   :  { %v415_v30 = vld [vmem:[%s2525_s2 + $0x30] sm:$0xf]  ;;  %v416_v31 = vld [vmem:[%s2525_s2 + $0x34] sm:$0xf]  ;;  %v433_v32 = vld [vmem:[%s2525_s2 + $0x78] sm:$0xf] }
  0x29   :  { %485 = vperm.xlu1 %1831, %v407_v13   ;;  %v434_v33 = vld [vmem:[%s2525_s2 + $0x7c] sm:$0xf]  ;;  %v417_v34 = vld [vmem:[%s2525_s2 + $0x38] sm:$0xf]  ;;  %v1148_v36 = vld [vmem:[%s2527_s4] sm:$0xf] }
  0x2a   :  { %v418_v35 = vld [vmem:[%s2525_s2 + $0x3c] sm:$0xf]  ;;  %v1149_v37 = vld [vmem:[%s2527_s4 + $0x4] sm:$0xf]  ;;  %v1150_v38 = vld [vmem:[%s2527_s4 + $0x8] sm:$0xf] }
  0x2b   :  { %v1151_v39 = vld [vmem:[%s2527_s4 + $0xc] sm:$0xf]  ;;  %v1152_v40 = vld [vmem:[%s2527_s4 + $0x10] sm:$0xf]  ;;  %v1153_v41 = vld [vmem:[%s2527_s4 + $0x14] sm:$0xf] }
  0x2c   :  { %v1154_v42 = vld [vmem:[%s2527_s4 + $0x18] sm:$0xf]  ;;  %v1155_v43 = vld [vmem:[%s2527_s4 + $0x1c] sm:$0xf]  ;;  %v1436_v44 = vld [vmem:[%s2528_s5] sm:$0xff]  ;;  %vm1548_vm1 = vcmask 64512  }
  0x2d   :  { %497 = vperm.xlu1 %1831, %v408_v14   ;;  %1830 = vset.pattern.permute.xlu0 %v1900_v3  ;;  %v1437_v45 = vld [vmem:[%s2528_s5 + $0x8] sm:$0xff]  ;;  %v1438_v46 = vld [vmem:[%s2528_s5 + $0x10] sm:$0xff]  ;;  %v1156_v47 = vld [vmem:[%s2527_s4 + $0x20] sm:$0xf]  ;;  %vm1603_vm2 = vcmask 57344  }
  0x2e   :  { %v1157_v48 = vld [vmem:[%s2527_s4 + $0x24] sm:$0xf]  ;;  %v1439_v49 = vld [vmem:[%s2528_s5 + $0x18] sm:$0xff]  ;;  %v1158_v51 = vld [vmem:[%s2527_s4 + $0x28] sm:$0xf] }
  0x2f   :  { %v1440_v50 = vld [vmem:[%s2528_s5 + $0x20] sm:$0xff]  ;;  %v1159_v52 = vld [vmem:[%s2527_s4 + $0x2c] sm:$0xf]  ;;  %v1442_v54 = vld [vmem:[%s2528_s5 + $0x30] sm:$0xff] }
  0x30   :  { %v1441_v53 = vld [vmem:[%s2528_s5 + $0x28] sm:$0xff]  ;;  %v1160_v55 = vld [vmem:[%s2527_s4 + $0x30] sm:$0xf]  ;;  %v1161_v56 = vld [vmem:[%s2527_s4 + $0x34] sm:$0xf] }
  0x31   :  { %701 = vperm.xlu1 %1831, %v425_v15   ;;  %v1443_v58 = vld [vmem:[%s2528_s5 + $0x38] sm:$0xff]  ;;  %v1444_v59 = vld [vmem:[%s2528_s5 + $0x40] sm:$0xff]  ;;  %v1445_v1 = vld [vmem:[%s2528_s5 + $0x48] sm:$0xff] }
  0x32   :  { %v1162_v62 = vld [vmem:[%s2527_s4 + $0x38] sm:$0xf]  ;;  %v1163_v63 = vld [vmem:[%s2527_s4 + $0x3c] sm:$0xf]  ;;  %v1446_v2 = vld [vmem:[%s2528_s5 + $0x50] sm:$0xff] }
  0x33   :  { %v1447_v6 = vld [vmem:[%s2528_s5 + $0x58] sm:$0xff]  ;;  %v1448_v7 = vld [vmem:[%s2528_s5 + $0x60] sm:$0xff]  ;;  %v1833_v8 = vld [vmem:[%s2524_s1 + $0x8] sm:$0xff]  }
  0x34   :  { %v1834_v9 = vld [vmem:[%s2524_s1 + $0x10] sm:$0xff]   ;;  %v1449_v10 = vld [vmem:[%s2528_s5 + $0x68] sm:$0xff]  ;;  %v1451_v12 = vld [vmem:[%s2528_s5 + $0x78] sm:$0xff] }
  0x35   :  { %713 = vperm.xlu1 %1831, %v426_v16   ;;  %v1450_v11 = vld [vmem:[%s2528_s5 + $0x70] sm:$0xff]  ;;  %v1586_v13 = vld [vmem:[#allocation2] sm:$0x1]  ;;  %v1835_v14 = vld [vmem:[%s2524_s1 + $0x18] sm:$0xff]  }
  0x36   :  { %v1836_v15 = vld [vmem:[%s2524_s1 + $0x20] sm:$0xff]   ;;  %v1837_v16 = vld [vmem:[%s2524_s1 + $0x28] sm:$0xff]  }
  0x39   :  { %509 = vperm.xlu1 %1831, %v409_v17   ;;  %629 = vperm.xlu0 %1830, %v419_v18   ;;  %v1838_v17 = vld [vmem:[%s2524_s1 + $0x30] sm:$0xff]   ;;  %v1839_v18 = vld [vmem:[%s2524_s1 + $0x38] sm:$0xff]  }
  0x3d   :  { %521 = vperm.xlu1 %1831, %v410_v19   ;;  %725 = vperm.xlu0 %1830, %v427_v20   ;;  %v1840_v19 = vld [vmem:[%s2524_s1 + $0x40] sm:$0xff]   ;;  %v1841_v20 = vld [vmem:[%s2524_s1 + $0x48] sm:$0xff]  }
  0x41   :  { %737 = vperm.xlu1 %1831, %v428_v21   ;;  %533 = vperm.xlu0 %1830, %v411_v22   ;;  %v1842_v21 = vld [vmem:[%s2524_s1 + $0x50] sm:$0xff]   ;;  %v1843_v22 = vld [vmem:[%s2524_s1 + $0x58] sm:$0xff]  }
  0x45   :  { %545 = vperm.xlu1 %1831, %v412_v23   ;;  %749 = vperm.xlu0 %1830, %v429_v24   ;;  %v1844_v23 = vld [vmem:[%s2524_s1 + $0x60] sm:$0xff]   ;;  %v1845_v24 = vld [vmem:[%s2524_s1 + $0x68] sm:$0xff]  }
  0x49   :  { %761 = vperm.xlu1 %1831, %v430_v25   ;;  %557 = vperm.xlu0 %1830, %v413_v26   ;;  %v1846_v25 = vld [vmem:[%s2524_s1 + $0x70] sm:$0xff]   ;;  %v1847_v26 = vld [vmem:[%s2524_s1 + $0x78] sm:$0xff]  }
  0x4d   :  { %569 = vperm.xlu1 %1831, %v414_v27   ;;  %773 = vperm.xlu0 %1830, %v431_v28  }
  0x51   :  { %785 = vperm.xlu1 %1831, %v432_v29   ;;  %581 = vperm.xlu0 %1830, %v415_v30   ;;  %v1850_v30 = vld [vmem:[%s2526_s3 + $0x4] ss:$8 sps:$4 sm:$0xff]  }
  0x55   :  { %593 = vperm.xlu1 %1831, %v416_v31   ;;  %797 = vperm.xlu0 %1830, %v433_v32   ;;  %v1853_v32 = vld [vmem:[%s2526_s3 + $0x14] ss:$8 sps:$4 sm:$0xff]  }
  0x56   :  { %1083 = vmatprep.mubr.bf16.mxu1 %v1853_v32 }
  0x59   :  { %809 = vperm.xlu1 %1831, %v434_v33   ;;  %605 = vperm.xlu0 %1830, %v417_v34  }
  0x5d   :  { %617 = vperm.xlu1 %1831, %v418_v35   ;;  %1166 = vperm.xlu0 %1830, %v1148_v36  }
  0x61   :  { %1178 = vperm.xlu1 %1831, %v1149_v37   ;;  %1190 = vperm.xlu0 %1830, %v1150_v38  }
  0x65   :  { %1202 = vperm.xlu1 %1831, %v1151_v39   ;;  %1214 = vperm.xlu0 %1830, %v1152_v40  }
  0x69   :  { %1226 = vperm.xlu1 %1831, %v1153_v41   ;;  %1238 = vperm.xlu0 %1830, %v1154_v42  }
  0x6d   :  { %1250 = vperm.xlu1 %1831, %v1155_v43   ;;  %1454 = vperm.xlu0 %1830, %v1436_v44  }
  0x71   :  { %1459 = vperm.xlu1 %1831, %v1437_v45   ;;  %1464 = vperm.xlu0 %1830, %v1438_v46  }
  0x75   :  { %1262 = vperm.xlu1 %1831, %v1156_v47   ;;  %1274 = vperm.xlu0 %1830, %v1157_v48  }
  0x79   :  { %1469 = vperm.xlu1 %1831, %v1439_v49   ;;  %1474 = vperm.xlu0 %1830, %v1440_v50  }
  0x7d   :  { %1286 = vperm.xlu1 %1831, %v1158_v51   ;;  %1298 = vperm.xlu0 %1830, %v1159_v52  }
  0x81   :  { %1479 = vperm.xlu1 %1831, %v1441_v53   ;;  %1484 = vperm.xlu0 %1830, %v1442_v54  }
  0x84   :  { %v47_v57 = vpop.trf.xlu0  ;;  %v2207_v27 = vpop.permute.xlu1 %641 }
  0x85   :  { %1310 = vperm.xlu1 %1831, %v1160_v55   ;;  %1322 = vperm.xlu0 %1830, %v1161_v56  }
  0x88   :  { %v48_v60 = vpop.trf.xlu0  ;;  %v2209_v28 = vpop.permute.xlu1 %437 }
  0x89   :  { %v63_v61 = vpack.c.bf16 %v48_v60, %v47_v57  ;;  %1489 = vperm.xlu1 %1831, %v1443_v58   ;;  %1494 = vperm.xlu0 %1830, %v1444_v59  }
  0x8b   :  { %1774 = vmatprep.subr.bf16.mxu0 %v63_v61 }
  0x8c   :  { %1775 = vmatpush3.bf16.msra.mxu0 %v63_v61  ;;  %v49_v0 = vpop.trf.xlu0  ;;  %v2211_v29 = vpop.permute.xlu1 %449 }
  0x8d   :  { %1334 = vperm.xlu1 %1831, %v1162_v62   ;;  %1346 = vperm.xlu0 %1830, %v1163_v63   ;;  %v1901_v62 = vmov 839922192  }
  0x8e   :  { %v441_v63 = vunpack.c.l.s4 %v1901_v62 }
  0x90   :  { %v50_v4 = vpop.trf.xlu0  ;;  %v2216_v31 = vpop.permute.xlu1 %653 }
  0x91   :  { %v64_v5 = vpack.c.bf16 %v50_v4, %v49_v0  ;;  %1499 = vperm.xlu1 %1831, %v1445_v1   ;;  %1504 = vperm.xlu0 %1830, %v1446_v2   ;;  %v443_v0 = vlaneseq }
  0x93   :  { %1776 = vmatprep.subr.bf16.mxu0 %v64_v5 }
  0x94   :  { %1777 = vmatpush3.bf16.msra.mxu0 %v64_v5  ;;  %v2221_v33 = vpop.permute.xlu1 %665 }
  0x95   :  { %1509 = vperm.xlu1 %1831, %v1447_v6   ;;  %1514 = vperm.xlu0 %1830, %v1448_v7   ;;  %v442_v7 = vunpack.c.0.s8 %v441_v63 }
  0x97   :  { %1779 = vmatmul.mubr.msk.bf16.vlgmr.msra.gmra.mrb[0].mxu0 %vm177_vm0, %v1833_v8  ;;  %v2281_v8 = vshrl.u32 %v443_v0, 7 }
  0x98   :  { %1782 = vmatprep.mubr.msk.bf16.mxu0 %vm177_vm0, %v1834_v9  ;;  %v2223_v34 = vpop.permute.xlu1 %461 }
  0x99   :  { %1519 = vperm.xlu1 %1831, %v1449_v10   ;;  %1524 = vperm.xlu0 %1830, %v1450_v11  }
  0x9c   :  { %v2225_v35 = vpop.permute.xlu1 %473 }
  0x9d   :  { %1529 = vperm.xlu1 %1831, %v1451_v12   ;;  %1589 = vperm.xlu0 %1830, %v1586_v13   ;;  %v2290_v12 = vsub.s32 %v442_v7, %v2281_v8 }
  0x9f   :  { %1783 = vmatmul.mubr.msk.bf16.gmra.mrb[4].mxu0 %vm177_vm0, %v1835_v14 }
  0xa0   :  { %1786 = vmatprep.mubr.msk.bf16.mxu0 %vm177_vm0, %v1836_v15  ;;  %v2227_v36 = vpop.permute.xlu1 %677 }
  0xa4   :  { %v2229_v37 = vpop.permute.xlu1 %689 }
  0xa7   :  { %1787 = vmatmul.mubr.msk.bf16.gmra.mrb[8].mxu0 %vm177_vm0, %v1837_v16 }
  0xa8   :  { %1790 = vmatprep.mubr.msk.bf16.mxu0 %vm177_vm0, %v1838_v17  ;;  %v2231_v38 = vpop.permute.xlu1 %485 }
  0xa9   :  { %v494_v63 = vrot.slane %v2231_v38, %v2290_v12 }
  0xac   :  { %v2233_v39 = vpop.permute.xlu1 %497 }
  0xad   :  { %v506_v0 = vrot.slane %v2233_v39, %v2290_v12 }
  0xaf   :  { %1791 = vmatmul.mubr.msk.bf16.gmra.mrb[12].mxu0 %vm177_vm0, %v1839_v18  ;;  %v446_v18 = vrot.slane %v2209_v28, %v2290_v12 }
  0xb0   :  { %1794 = vmatprep.mubr.msk.bf16.mxu0 %vm177_vm0, %v1840_v19  ;;  %v2235_v40 = vpop.permute.xlu1 %701  ;;  %v458_v19 = vrot.slane %v2211_v29, %v2290_v12  ;;  %v470_v29 = vrot.slane %v2223_v34, %v2290_v12  ;;  %v686_v34 = vrot.slane %v2227_v36, %v2290_v12 }
  0xb2   :  { %v1651_v32 = vcombine.low %v446_v18, %v458_v19 }
  0xb4   :  { %v2237_v41 = vpop.permute.xlu1 %713 }
  0xb5   :  { %v722_v38 = vrot.slane %v2237_v41, %v2290_v12 }
  0xb7   :  { %1795 = vmatmul.mubr.msk.bf16.gmra.mrb[16].mxu0 %vm177_vm0, %v1841_v20  ;;  %v650_v20 = vrot.slane %v2207_v27, %v2290_v12  ;;  %v482_v27 = vrot.slane %v2225_v35, %v2290_v12  ;;  %v698_v35 = vrot.slane %v2229_v37, %v2290_v12 }
  0xb8   :  { %1798 = vmatprep.mubr.msk.bf16.mxu0 %vm177_vm0, %v1842_v21  ;;  %v2245_v47 = vpop.permute.xlu1 %509  ;;  %v630_v50 = vpop.permute.xlu0 %629  ;;  %v662_v21 = vrot.slane %v2216_v31, %v2290_v12 }
  0xb9   :  { %v1652_v19 = vcombine.low %v470_v29, %v482_v27  ;;  %v518_v41 = vrot.slane %v2245_v47, %v2290_v12 }
  0xbc   :  { %v2251_v52 = vpop.permute.xlu1 %521  ;;  %v2261_v57 = vpop.permute.xlu0 %725 }
  0xbf   :  { %1799 = vmatmul.mubr.msk.bf16.gmra.mrb[20].mxu0 %vm177_vm0, %v1843_v22  ;;  %v674_v22 = vrot.slane %v2221_v33, %v2290_v12 }
  0xc0   :  { %1802 = vmatprep.mubr.msk.bf16.mxu0 %vm177_vm0, %v1844_v23  ;;  %v2263_v58 = vpop.permute.xlu1 %737  ;;  %v2277_v5 = vpop.permute.xlu0 %533  ;;  %v638_v23 = vrot.slane %v630_v50, %v2290_v12 }
  0xc2   :  { %v1659_v33 = vcombine.low %v638_v23, %v650_v20 }
  0xc4   :  { %v2279_v6 = vpop.permute.xlu1 %545  ;;  %v2292_v13 = vpop.permute.xlu0 %749 }
  0xc5   :  { %v554_v47 = vrot.slane %v2279_v6, %v2290_v12 }
  0xc7   :  { %1803 = vmatmul.mubr.msk.bf16.gmra.mrb[24].mxu0 %vm177_vm0, %v1845_v24 }
  0xc8   :  { %1806 = vmatprep.mubr.msk.bf16.mxu0 %vm177_vm0, %v1846_v25  ;;  %v2298_v16 = vpop.permute.xlu1 %761  ;;  %v2313_v25 = vpop.permute.xlu0 %557 }
  0xcc   :  { %v2327_v14 = vpop.permute.xlu0 %773 }
  0xcf   :  { %1807 = vmatmul.mubr.msk.bf16.gmra.mrb[28].mxu0 %vm177_vm0, %v1847_v26 }
  0xd0   :  { %1075 = vmatprep.mubr.bf16.mxu0 %v1850_v30  ;;  %v2315_v30 = vpop.permute.xlu1 %569  ;;  %v582_v29 = vpop.permute.xlu0 %581 }
  0xd4   :  { %v2335_v20 = vpop.permute.xlu1 %785 }
 0x16a   :  { %v2239_v42 = vpop.f32.mrb[0].mxu0 }
 0x16b   :  { %v260_v43 = vpop.f32.mrb[1].mxu0 }
 0x16c   :  { %v2241_v44 = vpop.f32.mrb[2].mxu0 }
 0x16d   :  { %v388_v45 = vpack.c.bf16 %v2241_v44, %v2239_v42  ;;  %v263_v46 = vpop.f32.mrb[3].mxu0  ;;  %v1661_v42 = vcombine.low %v686_v34, %v698_v35 }
 0x16e   :  { %v387_v48 = vpack.c.bf16 %v263_v46, %v260_v43  ;;  %v1660_v46 = vcombine.low %v662_v21, %v674_v22 }
 0x16f   :  { %v916_v36 = vadd.bf16 %v1652_v19, %v388_v45  ;;  %v798_v19 = vpop.permute.xlu0 %797 }
 0x170   :  { %v915_v50 = vadd.bf16 %v1651_v32, %v387_v48  ;;  %v710_v48 = vrot.slane %v2235_v40, %v2290_v12 }
 0x171   :  { %v932_v27 = vmax.bf16 %v1900_v3, %v916_v36 }
 0x172   :  { %v2247_v49 = vpop.f32.mrb[4].mxu0  ;;  %v931_v22 = vmax.bf16 %v1900_v3, %v915_v50  ;;  %v1662_v44 = vcombine.low %v710_v48, %v722_v38  ;;  %v734_v50 = vrot.slane %v2261_v57, %v2290_v12 }
 0x173   :  { %v2249_v51 = vpop.f32.mrb[5].mxu0 }
 0x174   :  { %v2253_v53 = vpop.f32.mrb[6].mxu0 }
 0x175   :  { %v390_v54 = vpack.c.bf16 %v2253_v53, %v2247_v49  ;;  %v2257_v55 = vpop.f32.mrb[7].mxu0 }
 0x176   :  { %v389_v56 = vpack.c.bf16 %v2257_v55, %v2249_v51  ;;  %v770_v51 = vrot.slane %v2298_v16, %v2290_v12  ;;  %v758_v55 = vrot.slane %v2292_v13, %v2290_v12  ;;  %v578_v16 = vrot.slane %v2315_v30, %v2290_v12 }
 0x177   :  { %v566_v13 = vrot.slane %v2313_v25, %v2290_v12  ;;  %v590_v25 = vrot.slane %v582_v29, %v2290_v12 }
 0x178   :  { %v1664_v53 = vcombine.low %v758_v55, %v770_v51  ;;  %v1857_v55 = vld [vmem:[%s2526_s3 + $0x34] ss:$8 sps:$4 sm:$0xff]  }
 0x17a   :  { %v2265_v59 = vpop.f32.mrb[8].mxu0 }
 0x17b   :  { %v2267_v60 = vpop.f32.mrb[9].mxu0 }
 0x17c   :  { %v2269_v61 = vpop.f32.mrb[10].mxu0 }
 0x17d   :  { %v392_v1 = vpack.c.bf16 %v2269_v61, %v2265_v59  ;;  %v2273_v2 = vpop.f32.mrb[11].mxu0 }
 0x17e   :  { %v391_v4 = vpack.c.bf16 %v2273_v2, %v2267_v60  ;;  %v806_v60 = vrot.slane %v798_v19, %v2290_v12 }
 0x182   :  { %v2283_v9 = vpop.f32.mrb[12].mxu0 }
 0x183   :  { %v2285_v10 = vpop.f32.mrb[13].mxu0 }
 0x184   :  { %v2287_v11 = vpop.f32.mrb[14].mxu0 }
 0x185   :  { %v2296_v15 = vpop.f32.mrb[15].mxu0 }
 0x186   :  { %v393_v17 = vpack.c.bf16 %v2296_v15, %v2285_v10  ;;  %v1848_v15 = vld [vmem:[%s2526_s3] ss:$8 sps:$4 sm:$0xff]  }
 0x18a   :  { %v1796_v24 = vpop.f32.mrb[16].mxu0 }
 0x18b   :  { %v324_v26 = vpop.f32.mrb[17].mxu0 }
 0x18c   :  { %v1797_v28 = vpop.f32.mrb[18].mxu0 }
 0x18d   :  { %v396_v31 = vpack.c.bf16 %v1797_v28, %v1796_v24  ;;  %v327_v43 = vpop.f32.mrb[19].mxu0  ;;  %v1653_v24 = vcombine.low %v494_v63, %v506_v0  ;;  %v746_v63 = vrot.slane %v2263_v58, %v2290_v12 }
 0x18e   :  { %v395_v62 = vpack.c.bf16 %v327_v43, %v324_v26  ;;  %v530_v26 = vrot.slane %v2251_v52, %v2290_v12  ;;  %v542_v52 = vrot.slane %v2277_v5, %v2290_v12  ;;  %v594_v43 = vpop.permute.xlu1 %593 }
 0x18f   :  { %v924_v7 = vadd.bf16 %v1660_v46, %v396_v31  ;;  %v917_v31 = vadd.bf16 %v1653_v24, %v389_v56  ;;  %v1663_v49 = vcombine.low %v734_v50, %v746_v63  ;;  %v794_v24 = vrot.slane %v2335_v20, %v2290_v12 }
 0x190   :  { %v923_v18 = vadd.bf16 %v1659_v33, %v395_v62  ;;  %v1654_v62 = vcombine.low %v518_v41, %v530_v26 }
 0x191   :  { %v940_v40 = vmax.bf16 %v1900_v3, %v924_v7  ;;  %v933_v57 = vmax.bf16 %v1900_v3, %v917_v31  ;;  %v1655_v7 = vcombine.low %v542_v52, %v554_v47 }
 0x192   :  { %v1800_v39 = vpop.f32.mrb[20].mxu0  ;;  %v939_v21 = vmax.bf16 %v1900_v3, %v923_v18  ;;  %v918_v6 = vadd.bf16 %v1654_v62, %v390_v54  ;;  %v810_v54 = vpop.permute.xlu1 %809  ;;  %v2531_v62 = vpack.c.bf16 %v2287_v11, %v2283_v9  ;;  %v1851_v9 = vld [vmem:[%s2526_s3 + $0x10] ss:$8 sps:$4 sm:$0xff]   ;;  %v1854_v11 = vld [vmem:[%s2526_s3 + $0x24] ss:$8 sps:$4 sm:$0xff]  }
 0x193   :  { %v340_v23 = vpop.f32.mrb[21].mxu0  ;;  %v919_v30 = vadd.bf16 %v1655_v7, %v391_v4  ;;  %v1866_v7 = vld [vmem:[%s2526_s3 + $0x64] ss:$8 sps:$4 sm:$0xff]  }
 0x194   :  { %v1801_v37 = vpop.f32.mrb[22].mxu0  ;;  %1710 = vmatprep.subr.bf16.mxu0 %v939_v21  ;;  %1810 = vmatprep.subr.bf16.mxu1 %v939_v21  ;;  %v934_v38 = vmax.bf16 %v1900_v3, %v918_v6  ;;  %v1862_v6 = vld [vmem:[%s2526_s3 + $0x40] ss:$8 sps:$4 sm:$0xff]  }
 0x195   :  { %v398_v28 = vpack.c.bf16 %v1801_v37, %v1800_v39  ;;  %v343_v32 = vpop.f32.mrb[23].mxu0  ;;  %1711 = vmatpush3.bf16.msra.mxu0 %v931_v22  ;;  %1818 = vmatpush3.bf16.msra.mxu1 %v931_v22  ;;  %v602_v39 = vrot.slane %v594_v43, %v2290_v12  ;;  %v1656_v22 = vcombine.low %v566_v13, %v578_v16  ;;  %v1871_v16 = vld [vmem:[%s2526_s3 + $0x70] ss:$8 sps:$4 sm:$0xff]  }
 0x196   :  { %v397_v45 = vpack.c.bf16 %v343_v32, %v340_v23  ;;  %1712 = vmatprep.subr.bf16.mxu0 %v940_v40  ;;  %1811 = vmatprep.subr.bf16.mxu1 %v940_v40  ;;  %v782_v23 = vrot.slane %v2327_v14, %v2290_v12  ;;  %v818_v37 = vrot.slane %v810_v54, %v2290_v12  ;;  %v606_v40 = vpop.permute.xlu0 %605 }
 0x197   :  { %v926_v46 = vadd.bf16 %v1662_v44, %v398_v28  ;;  %v920_v41 = vadd.bf16 %v1656_v22, %v392_v1  ;;  %v935_v26 = vmax.bf16 %v1900_v3, %v919_v30  ;;  %v618_v28 = vpop.permute.xlu1 %617  ;;  %v1657_v32 = vcombine.low %v590_v25, %v602_v39 }
 0x198   :  { %v925_v33 = vadd.bf16 %v1661_v42, %v397_v45  ;;  %v626_v44 = vrot.slane %v618_v28, %v2290_v12  ;;  %v614_v45 = vrot.slane %v606_v40, %v2290_v12  ;;  %v1665_v59 = vcombine.low %v782_v23, %v794_v24 }
 0x199   :  { %1713 = vmatpush3.bf16.msra.mxu0 %v932_v27  ;;  %1819 = vmatpush3.bf16.msra.mxu1 %v932_v27  ;;  %v942_v58 = vmax.bf16 %v1900_v3, %v926_v46  ;;  %v1666_v61 = vcombine.low %v806_v60, %v818_v37  ;;  %v936_v31 = vmax.bf16 %v1900_v3, %v920_v41 }
 0x19a   :  { %v1804_v56 = vpop.f32.mrb[24].mxu0  ;;  %v941_v5 = vmax.bf16 %v1900_v3, %v925_v33  ;;  %v921_v47 = vadd.bf16 %v1657_v32, %v393_v17  ;;  %v1658_v46 = vcombine.low %v614_v45, %v626_v44  ;;  %v1856_v17 = vld [vmem:[%s2526_s3 + $0x20] ss:$8 sps:$4 sm:$0xff]  }
 0x19b   :  { %v356_v0 = vpop.f32.mrb[25].mxu0  ;;  %v1179_v13 = vpop.permute.xlu1 %1178 }
 0x19c   :  { %v1805_v18 = vpop.f32.mrb[26].mxu0  ;;  %1714 = vmatprep.subr.bf16.mxu0 %v941_v5  ;;  %1812 = vmatprep.subr.bf16.mxu1 %v941_v5  ;;  %v922_v50 = vadd.bf16 %v1658_v46, %v2531_v62  ;;  %v937_v63 = vmax.bf16 %v1900_v3, %v921_v47  ;;  %v1860_v5 = vld [vmem:[%s2526_s3 + $0x44] ss:$8 sps:$4 sm:$0xff]   ;;  %v1187_v23 = vrot.slane %v1179_v13, %v2290_v12 }
 0x19d   :  { %v400_v34 = vpack.c.bf16 %v1805_v18, %v1804_v56  ;;  %v359_v35 = vpop.f32.mrb[27].mxu0  ;;  %1715 = vmatpush3.bf16.msra.mxu0 %v933_v57  ;;  %1820 = vmatpush3.bf16.msra.mxu1 %v933_v57  ;;  %v1859_v56 = vld [vmem:[%s2526_s3 + $0x30] ss:$8 sps:$4 sm:$0xff]   ;;  %v1863_v57 = vld [vmem:[%s2526_s3 + $0x54] ss:$8 sps:$4 sm:$0xff]  }
 0x19e   :  { %v399_v48 = vpack.c.bf16 %v359_v35, %v356_v0  ;;  %1716 = vmatprep.subr.bf16.mxu0 %v942_v58  ;;  %1813 = vmatprep.subr.bf16.mxu1 %v942_v58  ;;  %v938_v10 = vmax.bf16 %v1900_v3, %v922_v50  ;;  %v1865_v0 = vld [vmem:[%s2526_s3 + $0x50] ss:$8 sps:$4 sm:$0xff]   ;;  %v1868_v18 = vld [vmem:[%s2526_s3 + $0x60] ss:$8 sps:$4 sm:$0xff]   ;;  %v1869_v58 = vld [vmem:[%s2526_s3 + $0x74] ss:$8 sps:$4 sm:$0xff]  }
 0x19f   :  { %v928_v21 = vadd.bf16 %v1664_v53, %v400_v34  ;;  %v1203_v19 = vpop.permute.xlu1 %1202  ;;  %v1167_v34 = vpop.permute.xlu0 %1166  ;;  %s1902_s3 = smov [#allocation3]  }
 0x1a0   :  { %v927_v36 = vadd.bf16 %v1663_v49, %v399_v48  ;;  %v1175_v24 = vrot.slane %v1167_v34, %v2290_v12  ;;  %s1611_s0 = sshll.u32 %s1902_s3, 4  ;;  %s1612_s0 = int_to_ptr.vmem [resolvable:$true] %s1611_s0 }
 0x1a1   :  { %1717 = vmatpush3.bf16.msra.mxu0 %v934_v38  ;;  %1821 = vmatpush3.bf16.msra.mxu1 %v934_v38  ;;  %v944_v20 = vmax.bf16 %v1900_v3, %v928_v21  ;;  %s1876_s1 = scalar_lea.vmem %s1612_s0, 16  ;;  %s1880_s10 = scalar_lea.vmem %s1612_s0, 32 }
 0x1a2   :  { %v1808_v2 = vpop.f32.mrb[28].mxu0  ;;  %v943_v4 = vmax.bf16 %v1900_v3, %v927_v36  ;;  %v1683_v45 = vcombine.low %v1175_v24, %v1187_v23  ;;  %p1877_p0 = scmp.ne.s32.totalorder %s1612_s0, %s1876_s1  ;;  %p1881_p1 = scmp.lt.s32.totalorder %s1612_s0, %s1612_s0 }
 0x1a3   :  { %v372_v14 = vpop.f32.mrb[29].mxu0  ;;  %v1227_v35 = vpop.permute.xlu1 %1226  ;;  %p1882_p2 = scmp.lt.s32.totalorder %s1880_s10, %s1876_s1 }
 0x1a4   :  { %v1809_v42 = vpop.f32.mrb[30].mxu0  ;;  %1718 = vmatprep.subr.bf16.mxu0 %v943_v4  ;;  %1814 = vmatprep.subr.bf16.mxu1 %v943_v4  ;;  %v1191_v49 = vpop.permute.xlu0 %1190  ;;  %v1235_v50 = vrot.slane %v1227_v35, %v2290_v12 }
 0x1a5   :  { %v402_v29 = vpack.c.bf16 %v1809_v42, %v1808_v2  ;;  %v375_v27 = vpop.f32.mrb[31].mxu0  ;;  %1719 = vmatpush3.bf16.msra.mxu0 %v935_v26  ;;  %1822 = vmatpush3.bf16.msra.mxu1 %v935_v26  ;;  %v1211_v2 = vrot.slane %v1203_v19, %v2290_v12  ;;  %v1199_v4 = vrot.slane %v1191_v49, %v2290_v12  ;;  %p1883_p3 = por %p1882_p2, %p1881_p1 }
 0x1a6   :  { %v401_v1 = vpack.c.bf16 %v375_v27, %v372_v14  ;;  %1720 = vmatprep.subr.bf16.mxu0 %v944_v20  ;;  %1815 = vmatprep.subr.bf16.mxu1 %v944_v20 }
 0x1a7   :  { %v930_v52 = vadd.bf16 %v1666_v61, %v402_v29  ;;  %v2446_v53 = vpop.permute.xlu1 %1250  ;;  %v1684_v29 = vcombine.low %v1199_v4, %v1211_v2  ;;  %p1884_p4 = pnand %p1883_p3, %p1877_p0 }
 0x1a8   :  { %v929_v43 = vadd.bf16 %v1665_v59, %v401_v1  ;;  %v1215_v54 = vpop.permute.xlu0 %1214 }
 0x1a9   :  { %1721 = vmatpush3.bf16.msra.mxu0 %v936_v31  ;;  %1823 = vmatpush3.bf16.msra.mxu1 %v936_v31  ;;  %v946_v51 = vmax.bf16 %v1900_v3, %v930_v52 }
 0x1aa   :  { %v945_v33 = vmax.bf16 %v1900_v3, %v929_v43 }
 0x1ab   :  { %v1460_v48 = vpop.permute.xlu1 %1459 }
 0x1ac   :  { %1722 = vmatprep.subr.bf16.mxu0 %v945_v33  ;;  %1816 = vmatprep.subr.bf16.mxu1 %v945_v33  ;;  %v2448_v38 = vpop.permute.xlu0 %1238 }
 0x1ad   :  { %1723 = vmatpush3.bf16.msra.mxu0 %v937_v63  ;;  %1824 = vmatpush3.bf16.msra.mxu1 %v937_v63  ;;  %v1223_v63 = vrot.slane %v1215_v54, %v2290_v12  ;;  %v1259_v54 = vrot.slane %v2446_v53, %v2290_v12 }
 0x1ae   :  { %1724 = vmatprep.subr.bf16.mxu0 %v946_v51  ;;  %1817 = vmatprep.subr.bf16.mxu1 %v946_v51 }
 0x1af   :  { %v2450_v30 = vpop.permute.xlu1 %1262 }
 0x1b0   :  { %v1455_v39 = vpop.permute.xlu0 %1454 }
 0x1b1   :  { %1725 = vmatpush3.bf16.msra.mxu0 %v938_v10  ;;  %1825 = vmatpush3.bf16.msra.mxu1 %v938_v10 }
 0x1b3   :  { %v1470_v25 = vpop.permute.xlu1 %1469 }
 0x1b4   :  { %1076 = vmatmul.mubr.bf16.vlgmr.msra.gmra.mrb[32].mxu0 %v1848_v15  ;;  %1084 = vmatmul.mubr.bf16.vlgmr.msra.gmra.mrb[0].mxu1 %v1851_v9  ;;  %v1465_v21 = vpop.permute.xlu0 %1464 }
 0x1b5   :  { %1091 = vmatprep.mubr.bf16.mxu1 %v1854_v11 }
 0x1b7   :  { %v2458_v61 = vpop.permute.xlu1 %1286 }
 0x1b8   :  { %v2456_v44 = vpop.permute.xlu0 %1274 }
 0x1bc   :  { %1092 = vmatmul.mubr.bf16.gmra.mrb[4].mxu1 %v1856_v17  ;;  %v1475_v51 = vpop.permute.xlu0 %1474 }
 0x1bd   :  { %1099 = vmatprep.mubr.bf16.mxu1 %v1857_v55  ;;  %v1480_v55 = vpop.permute.xlu1 %1479 }
 0x1c0   :  { %v2466_v19 = vpop.permute.xlu0 %1298 }
 0x1c4   :  { %1100 = vmatmul.mubr.bf16.gmra.mrb[8].mxu1 %v1859_v56 }
 0x1c5   :  { %1107 = vmatprep.mubr.bf16.mxu1 %v1860_v5 }
 0x1cc   :  { %1108 = vmatmul.mubr.bf16.gmra.mrb[12].mxu1 %v1862_v6 }
 0x1cd   :  { %1115 = vmatprep.mubr.bf16.mxu1 %v1863_v57 }
 0x1d4   :  { %1116 = vmatmul.mubr.bf16.gmra.mrb[16].mxu1 %v1865_v0  ;;  %v1685_v0 = vcombine.low %v1223_v63, %v1235_v50 }
 0x1d5   :  { %1123 = vmatprep.mubr.bf16.mxu1 %v1866_v7 }
 0x1dc   :  { %1124 = vmatmul.mubr.bf16.gmra.mrb[20].mxu1 %v1868_v18 }
 0x1dd   :  { %1131 = vmatprep.mubr.bf16.mxu1 %v1869_v58 }
 0x1e4   :  { %1132 = vmatmul.mubr.bf16.gmra.mrb[24].mxu1 %v1871_v16 }
 0x287   :  { %v1726_v36 = vpop.f32.mrb[32].mxu0  ;;  %v1732_v22 = vpop.f32.mrb[0].mxu1 }
 0x288   :  { %v1727_v37 = vpop.f32.mrb[33].mxu0  ;;  %v1733_v60 = vpop.f32.mrb[1].mxu1 }
 0x289   :  { %v1728_v40 = vadd.f32 %v1727_v37, %v1726_v36  ;;  %v1734_v41 = vadd.f32 %v1733_v60, %v1732_v22  ;;  %v1729_v26 = vpop.f32.mrb[34].mxu0  ;;  %v1735_v14 = vpop.f32.mrb[2].mxu1 }
 0x28a   :  { %v1730_v28 = vpop.f32.mrb[35].mxu0  ;;  %v1736_v32 = vpop.f32.mrb[3].mxu1 }
 0x28b   :  { %v1731_v42 = vadd.f32 %v1730_v28, %v1729_v26  ;;  %v1737_v20 = vadd.f32 %v1736_v32, %v1735_v14  ;;  %v2473_v22 = vpop.permute.xlu1 %1310  ;;  %v1485_v26 = vpop.permute.xlu0 %1484 }
 0x28d   :  { %v1140_v27 = vpack.c.bf16 %v1731_v42, %v1728_v40  ;;  %v1141_v59 = vpack.c.bf16 %v1737_v20, %v1734_v41  ;;  %v1271_v42 = vrot.slane %v2450_v30, %v2290_v12 }
 0x28f   :  { %v1404_v1 = vadd.bf16 %v1683_v45, %v1140_v27  ;;  %v1405_v31 = vadd.bf16 %v1684_v29, %v1141_v59  ;;  %v1738_v47 = vpop.f32.mrb[4].mxu1  ;;  %v1490_v20 = vpop.permute.xlu1 %1489  ;;  %v1283_v27 = vrot.slane %v2456_v44, %v2290_v12 }
 0x290   :  { %v1739_v52 = vpop.f32.mrb[5].mxu1  ;;  %v1323_v30 = vpop.permute.xlu0 %1322 }
 0x291   :  { %v1412_v43 = vmax.bf16 %v1900_v3, %v1404_v1  ;;  %v1413_v46 = vmax.bf16 %v1900_v3, %v1405_v31  ;;  %v1740_v33 = vadd.f32 %v1739_v52, %v1738_v47  ;;  %v1741_v62 = vpop.f32.mrb[6].mxu1  ;;  %v1687_v63 = vcombine.low %v1271_v42, %v1283_v27 }
 0x292   :  { %v1742_v10 = vpop.f32.mrb[7].mxu1 }
 0x293   :  { %v1420_v15 = vunpack.c.l.bf16 %v1412_v43  ;;  %v1421_v9 = vunpack.c.h.bf16 %v1412_v43  ;;  %v1422_v11 = vunpack.c.l.bf16 %v1413_v46  ;;  %v1423_v17 = vunpack.c.h.bf16 %v1413_v46 }
 0x294   :  { %v1743_v56 = vadd.f32 %v1742_v10, %v1741_v62 }
 0x295   :  { %v1532_v5 = vmul.f32 %v1455_v39, %v1420_v15  ;;  %v1533_v6 = vmul.f32 %v1460_v48, %v1421_v9  ;;  %v1534_v57 = vmul.f32 %v1465_v21, %v1422_v11  ;;  %v1535_v16 = vmul.f32 %v1470_v25, %v1423_v17  ;;  %v2484_v9 = vpop.permute.xlu1 %1334 }
 0x296   :  { %v1142_v7 = vpack.c.bf16 %v1743_v56, %v1740_v33  ;;  %v1247_v48 = vrot.slane %v2448_v38, %v2290_v12 }
 0x297   :  { %v1549_v18 = vsel %vm1548_vm1, %v1532_v5, 0.0  ;;  %v1550_v58 = vsel %vm1548_vm1, %v1533_v6, 0.0  ;;  %v1744_v13 = vpop.f32.mrb[8].mxu1  ;;  %v1552_v39 = vsel %vm1548_vm1, %v1534_v57, 0.0  ;;  %v1554_v37 = vsel %vm1548_vm1, %v1535_v16, 0.0 }
 0x298   :  { %v1551_v34 = vadd.f32 %v1550_v58, %v1549_v18  ;;  %v1406_v35 = vadd.bf16 %v1685_v0, %v1142_v7  ;;  %v1745_v49 = vpop.f32.mrb[9].mxu1  ;;  %v1686_v53 = vcombine.low %v1247_v48, %v1259_v54  ;;  %v1307_v6 = vrot.slane %v2466_v19, %v2290_v12  ;;  %v1495_v58 = vpop.permute.xlu0 %1494 }
 0x299   :  { %v1746_v21 = vadd.f32 %v1745_v49, %v1744_v13  ;;  %v1747_v36 = vpop.f32.mrb[10].mxu1  ;;  %v1500_v54 = vpop.permute.xlu1 %1499 }
 0x29a   :  { %v1553_v23 = vadd.f32 %v1552_v39, %v1551_v34  ;;  %v1414_v25 = vmax.bf16 %v1900_v3, %v1406_v35  ;;  %v1748_v24 = vpop.f32.mrb[11].mxu1 }
 0x29b   :  { %v1749_v60 = vadd.f32 %v1748_v24, %v1747_v36 }
 0x29c   :  { %v1555_v2 = vadd.f32 %v1554_v37, %v1553_v23  ;;  %v1424_v4 = vunpack.c.l.bf16 %v1414_v25  ;;  %v1425_v40 = vunpack.c.h.bf16 %v1414_v25  ;;  %v1319_v25 = vrot.slane %v2473_v22, %v2290_v12  ;;  %v1347_v24 = vpop.permute.xlu0 %1346 }
 0x29d   :  { %v1143_v41 = vpack.c.bf16 %v1749_v60, %v1746_v21  ;;  %v1510_v42 = vpop.permute.xlu1 %1509 }
 0x29e   :  { %v1536_v38 = vmul.f32 %v1475_v51, %v1424_v4  ;;  %v1537_v14 = vmul.f32 %v1480_v55, %v1425_v40  ;;  %v1295_v55 = vrot.slane %v2458_v61, %v2290_v12 }
 0x29f   :  { %v1407_v28 = vadd.bf16 %v1686_v53, %v1143_v41  ;;  %v1750_v32 = vpop.f32.mrb[12].mxu1 }
 0x2a0   :  { %v1556_v45 = vsel %vm1548_vm1, %v1536_v38, 0.0  ;;  %v1751_v29 = vpop.f32.mrb[13].mxu1  ;;  %v1558_v52 = vsel %vm1548_vm1, %v1537_v14, 0.0  ;;  %v1688_v48 = vcombine.low %v1295_v55, %v1307_v6 }
 0x2a1   :  { %v1557_v59 = vadd.f32 %v1556_v45, %v1555_v2  ;;  %v1415_v1 = vmax.bf16 %v1900_v3, %v1407_v28  ;;  %v1752_v31 = vadd.f32 %v1751_v29, %v1750_v32  ;;  %v1753_v47 = vpop.f32.mrb[14].mxu1  ;;  %v1331_v2 = vrot.slane %v1323_v30, %v2290_v12 }
 0x2a2   :  { %v1754_v43 = vpop.f32.mrb[15].mxu1 }
 0x2a3   :  { %v1559_v46 = vadd.f32 %v1558_v52, %v1557_v59  ;;  %v1426_v33 = vunpack.c.l.bf16 %v1415_v1  ;;  %v1427_v62 = vunpack.c.h.bf16 %v1415_v1  ;;  %v1755_v50 = vadd.f32 %v1754_v43, %v1753_v47 }
 0x2a4   :  { %v1689_v45 = vcombine.low %v1319_v25, %v1331_v2  ;;  %v1343_v47 = vrot.slane %v2484_v9, %v2290_v12 }
 0x2a5   :  { %v1538_v51 = vmul.f32 %v1485_v26, %v1426_v33  ;;  %v1539_v10 = vmul.f32 %v1490_v20, %v1427_v62  ;;  %v1144_v15 = vpack.c.bf16 %v1755_v50, %v1752_v31  ;;  %v1505_v20 = vpop.permute.xlu0 %1504 }
 0x2a7   :  { %v1560_v44 = vsel %vm1548_vm1, %v1538_v51, 0.0  ;;  %v1408_v11 = vadd.bf16 %v1687_v63, %v1144_v15  ;;  %v1756_v17 = vpop.f32.mrb[16].mxu1  ;;  %v1562_v57 = vsel %vm1548_vm1, %v1539_v10, 0.0 }
 0x2a8   :  { %v1561_v56 = vadd.f32 %v1560_v44, %v1559_v46  ;;  %v1757_v5 = vpop.f32.mrb[17].mxu1  ;;  %v1355_v46 = vrot.slane %v1347_v24, %v2290_v12 }
 0x2a9   :  { %v1416_v0 = vmax.bf16 %v1900_v3, %v1408_v11  ;;  %v1758_v7 = vadd.f32 %v1757_v5, %v1756_v17  ;;  %v1759_v18 = vpop.f32.mrb[18].mxu1  ;;  %v1520_v11 = vpop.permute.xlu1 %1519 }
 0x2aa   :  { %v1563_v16 = vadd.f32 %v1562_v57, %v1561_v56  ;;  %v1760_v13 = vpop.f32.mrb[19].mxu1  ;;  %v1515_v17 = vpop.permute.xlu0 %1514  ;;  %v1690_v55 = vcombine.low %v1343_v47, %v1355_v46 }
 0x2ab   :  { %v1428_v34 = vunpack.c.l.bf16 %v1416_v0  ;;  %v1429_v35 = vunpack.c.h.bf16 %v1416_v0  ;;  %v1761_v49 = vadd.f32 %v1760_v13, %v1759_v18 }
 0x2ad   :  { %v1540_v61 = vmul.f32 %v1495_v58, %v1428_v34  ;;  %v1541_v39 = vmul.f32 %v1500_v54, %v1429_v35  ;;  %v1145_v21 = vpack.c.bf16 %v1761_v49, %v1758_v7  ;;  %v1530_v13 = vpop.permute.xlu1 %1529 }
 0x2ae   :  { %v1525_v34 = vpop.permute.xlu0 %1524 }
 0x2af   :  { %v1564_v36 = vsel %vm1548_vm1, %v1540_v61, 0.0  ;;  %v1409_v19 = vadd.bf16 %v1688_v48, %v1145_v21  ;;  %v1762_v23 = vpop.f32.mrb[20].mxu1  ;;  %v1566_v4 = vsel %vm1548_vm1, %v1541_v39, 0.0 }
 0x2b0   :  { %v1565_v37 = vadd.f32 %v1564_v36, %v1563_v16  ;;  %v1763_v60 = vpop.f32.mrb[21].mxu1 }
 0x2b1   :  { %v1417_v40 = vmax.bf16 %v1900_v3, %v1409_v19  ;;  %v1764_v53 = vadd.f32 %v1763_v60, %v1762_v23  ;;  %v1765_v41 = vpop.f32.mrb[22].mxu1  ;;  %v1594_v23 = vsub.s32 0, %v2281_v8 }
 0x2b2   :  { %v1567_v26 = vadd.f32 %v1566_v4, %v1565_v37  ;;  %v1766_v38 = vpop.f32.mrb[23].mxu1 }
 0x2b3   :  { %v1430_v14 = vunpack.c.l.bf16 %v1417_v40  ;;  %v1431_v28 = vunpack.c.h.bf16 %v1417_v40  ;;  %v1767_v32 = vadd.f32 %v1766_v38, %v1765_v41 }
 0x2b5   :  { %v1542_v22 = vmul.f32 %v1505_v20, %v1430_v14  ;;  %v1543_v29 = vmul.f32 %v1510_v42, %v1431_v28  ;;  %v1146_v27 = vpack.c.bf16 %v1767_v32, %v1764_v53 }
 0x2b7   :  { %v1568_v59 = vsel %vm1548_vm1, %v1542_v22, 0.0  ;;  %v1410_v1 = vadd.bf16 %v1689_v45, %v1146_v27  ;;  %v1768_v31 = vpop.f32.mrb[24].mxu1  ;;  %v1570_v33 = vsel %vm1548_vm1, %v1543_v29, 0.0 }
 0x2b8   :  { %v1569_v52 = vadd.f32 %v1568_v59, %v1567_v26  ;;  %v1769_v43 = vpop.f32.mrb[25].mxu1 }
 0x2b9   :  { %v1418_v62 = vmax.bf16 %v1900_v3, %v1410_v1  ;;  %v1770_v50 = vadd.f32 %v1769_v43, %v1768_v31  ;;  %v1771_v30 = vpop.f32.mrb[26].mxu1 }
 0x2ba   :  { %v1571_v63 = vadd.f32 %v1570_v33, %v1569_v52  ;;  %v1772_v51 = vpop.f32.mrb[27].mxu1 }
 0x2bb   :  { %v1432_v10 = vunpack.c.l.bf16 %v1418_v62  ;;  %v1433_v15 = vunpack.c.h.bf16 %v1418_v62  ;;  %v1773_v44 = vadd.f32 %v1772_v51, %v1771_v30 }
 0x2bd   :  { %v1544_v56 = vmul.f32 %v1515_v17, %v1432_v10  ;;  %v1545_v9 = vmul.f32 %v1520_v11, %v1433_v15  ;;  %v1147_v5 = vpack.c.bf16 %v1773_v44, %v1770_v50 }
 0x2bf   :  { %v1572_v6 = vsel %vm1548_vm1, %v1544_v56, 0.0  ;;  %v1411_v12 = vadd.bf16 %v1690_v55, %v1147_v5  ;;  %v1574_v0 = vsel %vm1548_vm1, %v1545_v9, 0.0 }
 0x2c0   :  { %v1573_v57 = vadd.f32 %v1572_v6, %v1571_v63 }
 0x2c1   :  { %v1419_v7 = vmax.bf16 %v1900_v3, %v1411_v12  ;;  %v1590_v3 = vpop.permute.xlu0 %1589 }
 0x2c2   :  { %v1575_v18 = vadd.f32 %v1574_v0, %v1573_v57  ;;  %v1595_v37 = vrot.slane %v1590_v3, %v1594_v23 }
 0x2c3   :  { %v1434_v58 = vunpack.c.l.bf16 %v1419_v7  ;;  %v1435_v16 = vunpack.c.h.bf16 %v1419_v7 }
 0x2c5   :  { %v1546_v35 = vmul.f32 %v1525_v34, %v1434_v58  ;;  %v1547_v49 = vmul.f32 %v1530_v13, %v1435_v16 }
 0x2c7   :  { %v1576_v54 = vsel %vm1548_vm1, %v1546_v35, 0.0  ;;  %v1578_v61 = vsel %vm1548_vm1, %v1547_v49, 0.0 }
 0x2c8   :  { %v1577_v48 = vadd.f32 %v1576_v54, %v1575_v18 }
 0x2ca   :  { %v1579_v39 = vadd.f32 %v1578_v61, %v1577_v48 }
 0x2cc   :  { %v1580_v21 = vrot.slane %v1579_v39, 4 }
 0x2ce   :  { %v1581_v36 = vadd.f32 %v1580_v21, %v1579_v39 }
 0x2d0   :  { %v1582_v19 = vrot.slane %v1581_v36, 2 }
 0x2d2   :  { %v1583_v25 = vadd.f32 %v1582_v19, %v1581_v36 }
 0x2d4   :  { %v1584_v24 = vrot.slane %v1583_v25, 1 }
 0x2d6   :  { %v1585_v60 = vadd.f32 %v1584_v24, %v1583_v25 }
 0x2d8   :  { %v1596_v2 = vadd.f32 %v1595_v37, %v1585_v60 }
 0x2da   :  { %v1691_v4 = vmul.f32 -1.442695, %v1596_v2 }
 0x2dc   :  { %1872 = vpow2.f32 %v1691_v4 }
 0x2e6   :  { %v1873_v40 = vpop.eup %1872 }
 0x2e7   :  { %v1600_v53 = vadd.f32 1.0, %v1873_v40 }
 0x2e9   :  { %1874 = vrcp.f32 %v1600_v53 }
 0x2f3   :  { %v1875_v41 = vpop.eup %1874 }
 0x2f4   :  { %1604 = vst.msk [vmem:[#allocation3] sm:$0x1] %vm1603_vm2, %v1875_v41 }
 0x2f5   :  { %1887 = shalt.err (!%p1884_p4)
}
 0x2f6   :  { %s1888_s13 = scalar_lea.hbm %s2530_s7, 16 }
 0x2f7   :  { %p1889_p5 = scmp.ne.s32.totalorder %s2530_s7, %s1888_s13  ;;  %p1892_p6 = scmp.lt.u32.totalorder %s1888_s13, %s2530_s7 }
 0x2f9   :  { %p1894_p7 = pnand %p1892_p6, %p1889_p5 }
 0x2fb   :  { %1897 = shalt.err (!%p1894_p7)
}
 0x2fc   :  { %1614 = dma.vmem_to_hbm [thread:$0]  %s1612_s0, 16, %s2530_s7, [#allocation4]  }
 0x2fd   :  { %1898 = dma.done.wait [#allocation4], 16  }
 0x2fe   :  { %1899 = vsyncadd [#allocation4], 4294967280 }
 0x2ff   :  { %1618 = vsyncpa [#allocation4], 1 }

</bundles_post_ra>
